<compile_context>
chip_gen: v5e
topology: v5e:2x2
jax: 0.10.0
libtpu: 0.0.40
codegen_flags: <defaults>
</compile_context>

<pallas_src>
import functools

import jax
import jax.numpy as jnp
from jax.experimental import pallas as pl
from jax.experimental.pallas import tpu as pltpu


def qnetwork_kernel(x_ref, w1_ref, b1_ref, w2_ref, b2_ref, w3_ref, b3_ref,
                    out_ref, *, bf16_epilogue):
    """Fused 3-layer MLP forward: Linear->ReLU->Linear->ReLU->Linear.

    x arrives in its native f32 and is cast to the weight dtype in-kernel
    (idle VPU slots).  MXU accumulation and bias add are f32; on bf16-VPU
    chips the ReLU runs on the packed bf16 value (identical result).
    """
    cdt = w1_ref.dtype
    x = x_ref[...].astype(cdt)

    def layer(h, w_ref, b_ref, relu):
        acc = jnp.dot(h, w_ref[...], preferred_element_type=jnp.float32)
        acc = acc + b_ref[...]
        if not relu:
            return acc
        if bf16_epilogue:
            # cast first, ReLU on packed bf16 (v6e/v7x bf16 VALU)
            return jnp.maximum(acc.astype(cdt), 0)
        # f32 ReLU then cast (v5e: no bf16 VPU)
        return jnp.maximum(acc, 0.0).astype(cdt)

    h1 = layer(x, w1_ref, b1_ref, relu=True)
    h2 = layer(h1, w2_ref, b2_ref, relu=True)
    out = layer(h2, w3_ref, b3_ref, relu=False)
    out_ref[...] = out.astype(out_ref.dtype)


def _round_up(x, m):
    return ((x + m - 1) // m) * m


@functools.partial(
    jax.jit, static_argnames=("block_batch", "out_dtype", "bf16_epilogue"))
def qnetwork_forward(state, padded_params, *, block_batch=4096,
                     out_dtype=jnp.bfloat16, bf16_epilogue=True):
    """Runs the fused MLP with a 1-D batch grid.

    `padded_params` come from `prepare_params` (hidden padded to 128, weights
    in the compute dtype stored [in, out], biases f32).
    """
    w1, b1, w2, b2, w3, b3 = padded_params
    B, state_size = state.shape
    hp = w1.shape[1]
    action_size = w3.shape[1]

    # --- batch tile selection ---------------------------------------------
    # * B > block_batch : tile at block_batch (rounded to a multiple of 8).
    # * 512 <= B <= block_batch : split into >=2 steps so v7x can shard the
    #   "parallel" grid axis across both TensorCores and the pipeline has a
    #   prefetch step.
    # * tiny B : single full-extent block (always a legal block shape).
    if B > block_batch:
        tb = _round_up(min(block_batch, B), 8)
    elif B >= 512:
        tb = _round_up(pl.cdiv(B, 2), 8)
    else:
        tb = B
    grid = (pl.cdiv(B, tb),)

    def const_spec(shape):
        # Constant block index -> weight/bias stays resident in VMEM across steps.
        return pl.BlockSpec(shape, lambda i: (0, 0))

    param_bytes = sum(int(p.size) * p.dtype.itemsize for p in padded_params)
    out_itemsize = jnp.dtype(out_dtype).itemsize
    cost = pl.CostEstimate(
        flops=2 * B * (state_size * hp + hp * hp + hp * action_size),
        bytes_accessed=(B * state_size * state.dtype.itemsize
                        + B * action_size * out_itemsize + param_bytes),
        transcendentals=0,
    )

    kernel = functools.partial(qnetwork_kernel, bf16_epilogue=bf16_epilogue)

    return pl.pallas_call(
        kernel,
        out_shape=jax.ShapeDtypeStruct((B, action_size), out_dtype),
        grid=grid,
        in_specs=[
            pl.BlockSpec((tb, state_size), lambda i: (i, 0)),   # state tile (f32)
            const_spec((state_size, hp)),                       # w1
            const_spec((1, hp)),                                # b1
            const_spec((hp, hp)),                               # w2
            const_spec((1, hp)),                                # b2
            const_spec((hp, action_size)),                      # w3
            const_spec((1, action_size)),                       # b3
        ],
        out_specs=pl.BlockSpec((tb, action_size), lambda i: (i, 0)),
        compiler_params=pltpu.CompilerParams(
            dimension_semantics=("parallel",),  # megacore sharding on v7x
        ),
        cost_estimate=cost,
    )(state, w1, b1, w2, b2, w3, b3)


def init_params(key, state_size, action_size, hidden=50):
    """PyTorch nn.Linear-style init U(-1/sqrt(fan_in), 1/sqrt(fan_in)).

    Weights are stored transposed vs. PyTorch, i.e. [in_features, out_features].
    """
    keys = jax.random.split(key, 6)

    def linear(kw, kb, fan_in, fan_out):
        bound = 1.0 / jnp.sqrt(jnp.float32(fan_in))
        w = jax.random.uniform(kw, (fan_in, fan_out), jnp.float32, -bound, bound)
        b = jax.random.uniform(kb, (1, fan_out), jnp.float32, -bound, bound)
        return w, b

    w1, b1 = linear(keys[0], keys[1], state_size, hidden)
    w2, b2 = linear(keys[2], keys[3], hidden, hidden)
    w3, b3 = linear(keys[4], keys[5], hidden, action_size)
    return (w1, b1, w2, b2, w3, b3)


def prepare_params(params, hidden_pad=128, compute_dtype=jnp.bfloat16):
    """Zero-pad the hidden dim to a lane-dense 128; cast weights to compute dtype.

    Padded w1 columns / b1 entries are zero -> padded h1 lanes are ReLU(0)=0;
    padded w2 rows/cols and w3 rows are zero -> outputs numerically identical.
    Biases stay f32 (bias add runs in f32).
    """
    w1, b1, w2, b2, w3, b3 = params
    state_size, hidden = w1.shape
    action_size = w3.shape[1]
    hp = max(hidden_pad, hidden)
    hp = ((hp + 127) // 128) * 128

    w1p = jnp.zeros((state_size, hp), compute_dtype).at[:, :hidden].set(
        w1.astype(compute_dtype))
    b1p = jnp.zeros((1, hp), jnp.float32).at[:, :hidden].set(b1)
    w2p = jnp.zeros((hp, hp), compute_dtype).at[:hidden, :hidden].set(
        w2.astype(compute_dtype))
    b2p = jnp.zeros((1, hp), jnp.float32).at[:, :hidden].set(b2)
    w3p = jnp.zeros((hp, action_size), compute_dtype).at[:hidden, :].set(
        w3.astype(compute_dtype))
    b3p = b3.astype(jnp.float32)
    return (w1p, b1p, w2p, b2p, w3p, b3p)


def qnetwork_reference(state, params, compute_dtype=jnp.float32):
    """Pure-JAX reference matching the PyTorch forward (optionally with the
    same bf16 compute path as the kernel)."""
    w1, b1, w2, b2, w3, b3 = params
    x = state.astype(compute_dtype)
    h = jnp.dot(x, w1.astype(compute_dtype),
                preferred_element_type=jnp.float32) + b1
    h = jnp.maximum(h, 0.0).astype(compute_dtype)
    h = jnp.dot(h, w2.astype(compute_dtype),
                preferred_element_type=jnp.float32) + b2
    h = jnp.maximum(h, 0.0).astype(compute_dtype)
    return jnp.dot(h, w3.astype(compute_dtype),
                   preferred_element_type=jnp.float32) + b3


def _bf16_epilogue_default():
    """bf16 VALU exists on v6e/v7x; keep the f32 epilogue elsewhere (v5e etc.)."""
    try:
        kind = jax.devices()[0].device_kind.lower()
        return ("v6" in kind) or ("v7" in kind)
    except Exception:
        return True


if __name__ == "__main__":
    key = jax.random.PRNGKey(0)
    k_param, k_state, k_state2 = jax.random.split(key, 3)

    batch = 8
    state_size = 16
    action_size = 4

    params = init_params(k_param, state_size, action_size, hidden=50)
    padded_params = prepare_params(params, hidden_pad=128,
                                   compute_dtype=jnp.bfloat16)
    bf16_ep = _bf16_epilogue_default()

    # --- small single-block run ---
    state = jax.random.normal(k_state, (batch, state_size), jnp.float32)
    out = qnetwork_forward(state, padded_params, bf16_epilogue=bf16_ep)
    out = jax.block_until_ready(out)
    assert out.shape == (batch, action_size)
    out_f32 = out.astype(jnp.float32)

    # Tight check vs. a reference using the same bf16 compute path.
    ref_bf16 = qnetwork_reference(state, params, compute_dtype=jnp.bfloat16)
    assert jnp.allclose(out_f32, ref_bf16, atol=2e-2, rtol=2e-2), "bf16-path mismatch"

    # Loose semantic check vs. the exact f32 PyTorch-equivalent forward.
    ref_f32 = qnetwork_reference(state, params, compute_dtype=jnp.float32)
    assert jnp.allclose(out_f32, ref_f32, atol=5e-2, rtol=5e-2), "f32 semantic mismatch"

    # --- multi-block grid run (weights resident across 3 grid steps) ---
    batch2 = 96
    state2 = jax.random.normal(k_state2, (batch2, state_size), jnp.float32)
    out2 = qnetwork_forward(state2, padded_params, block_batch=32,
                            bf16_epilogue=bf16_ep)
    out2 = jax.block_until_ready(out2)
    assert out2.shape == (batch2, action_size)
    ref2 = qnetwork_reference(state2, params, compute_dtype=jnp.bfloat16)
    assert jnp.allclose(out2.astype(jnp.float32), ref2, atol=2e-2, rtol=2e-2), \
        "multi-block mismatch"

    print("KERNEL_OK")
</pallas_src>

<mosaic_0001>
module attributes {stable_mosaic.version = 11 : i64} {
  func.func @qnetwork_kernel(%arg0: i32, %arg1: memref<8x16xf32, #tpu.memory_space<vmem>>, %arg2: memref<16x128xbf16, #tpu.memory_space<vmem>>, %arg3: memref<1x128xf32, #tpu.memory_space<vmem>>, %arg4: memref<128x128xbf16, #tpu.memory_space<vmem>>, %arg5: memref<1x128xf32, #tpu.memory_space<vmem>>, %arg6: memref<128x4xbf16, #tpu.memory_space<vmem>>, %arg7: memref<1x4xf32, #tpu.memory_space<vmem>>, %arg8: memref<8x4xbf16, #tpu.memory_space<vmem>>) attributes {dimension_semantics = [#tpu.dimension_semantics<parallel>], iteration_bounds = array<i64: 1>, scalar_prefetch = 0 : i64, scratch_operands = 0 : i64, tpu.core_type = #tpu.core_type<tc>, window_params = [{transform_indices = @transform_0, window_bounds = array<i64: 8, 16>}, {pipeline_mode = #tpu.pipeline_mode<synchronous>, transform_indices = @transform_1, window_bounds = array<i64: 16, 128>}, {pipeline_mode = #tpu.pipeline_mode<synchronous>, transform_indices = @transform_2, window_bounds = array<i64: 1, 128>}, {pipeline_mode = #tpu.pipeline_mode<synchronous>, transform_indices = @transform_3, window_bounds = array<i64: 128, 128>}, {pipeline_mode = #tpu.pipeline_mode<synchronous>, transform_indices = @transform_4, window_bounds = array<i64: 1, 128>}, {pipeline_mode = #tpu.pipeline_mode<synchronous>, transform_indices = @transform_5, window_bounds = array<i64: 128, 4>}, {pipeline_mode = #tpu.pipeline_mode<synchronous>, transform_indices = @transform_6, window_bounds = array<i64: 1, 4>}, {transform_indices = @transform_7, window_bounds = array<i64: 8, 4>}]} {
    %c0 = arith.constant 0 : index
    %c0_0 = arith.constant 0 : index
    %0 = vector.load %arg1[%c0, %c0_0] : memref<8x16xf32, #tpu.memory_space<vmem>>, vector<8x16xf32>
    %1 = arith.truncf %0 : vector<8x16xf32> to vector<8x16xbf16>
    %c0_1 = arith.constant 0 : index
    %c0_2 = arith.constant 0 : index
    %2 = vector.load %arg2[%c0_1, %c0_2] : memref<16x128xbf16, #tpu.memory_space<vmem>>, vector<16x128xbf16>
    %cst = arith.constant dense<0.000000e+00> : vector<8x128xf32>
    %3 = tpu.matmul %1, %2, %cst {dimension_numbers = #tpu.dot_dimension_numbers<[1], [0], [0], [1], [0, 0, 1, 1], [], []>} : vector<8x16xbf16>, vector<16x128xbf16>, vector<8x128xf32> -> vector<8x128xf32>
    %c0_3 = arith.constant 0 : index
    %c0_4 = arith.constant 0 : index
    %4 = vector.load %arg3[%c0_3, %c0_4] : memref<1x128xf32, #tpu.memory_space<vmem>>, vector<1x128xf32>
    %5 = vector.broadcast %4 : vector<1x128xf32> to vector<8x128xf32>
    %6 = arith.addf %3, %5 : vector<8x128xf32>
    %cst_5 = arith.constant 0.000000e+00 : f32
    %7 = vector.broadcast %cst_5 : f32 to vector<8x128xf32>
    %8 = arith.maximumf %6, %7 : vector<8x128xf32>
    %9 = arith.truncf %8 : vector<8x128xf32> to vector<8x128xbf16>
    %c0_6 = arith.constant 0 : index
    %c0_7 = arith.constant 0 : index
    %10 = vector.load %arg4[%c0_6, %c0_7] : memref<128x128xbf16, #tpu.memory_space<vmem>>, vector<128x128xbf16>
    %cst_8 = arith.constant dense<0.000000e+00> : vector<8x128xf32>
    %11 = tpu.matmul %9, %10, %cst_8 {dimension_numbers = #tpu.dot_dimension_numbers<[1], [0], [0], [1], [0, 0, 1, 1], [], []>} : vector<8x128xbf16>, vector<128x128xbf16>, vector<8x128xf32> -> vector<8x128xf32>
    %c0_9 = arith.constant 0 : index
    %c0_10 = arith.constant 0 : index
    %12 = vector.load %arg5[%c0_9, %c0_10] : memref<1x128xf32, #tpu.memory_space<vmem>>, vector<1x128xf32>
    %13 = vector.broadcast %12 : vector<1x128xf32> to vector<8x128xf32>
    %14 = arith.addf %11, %13 : vector<8x128xf32>
    %cst_11 = arith.constant 0.000000e+00 : f32
    %15 = vector.broadcast %cst_11 : f32 to vector<8x128xf32>
    %16 = arith.maximumf %14, %15 : vector<8x128xf32>
    %17 = arith.truncf %16 : vector<8x128xf32> to vector<8x128xbf16>
    %c0_12 = arith.constant 0 : index
    %c0_13 = arith.constant 0 : index
    %18 = vector.load %arg6[%c0_12, %c0_13] : memref<128x4xbf16, #tpu.memory_space<vmem>>, vector<128x4xbf16>
    %cst_14 = arith.constant dense<0.000000e+00> : vector<8x4xf32>
    %19 = tpu.matmul %17, %18, %cst_14 {dimension_numbers = #tpu.dot_dimension_numbers<[1], [0], [0], [1], [0, 0, 1, 1], [], []>} : vector<8x128xbf16>, vector<128x4xbf16>, vector<8x4xf32> -> vector<8x4xf32>
    %c0_15 = arith.constant 0 : index
    %c0_16 = arith.constant 0 : index
    %20 = vector.load %arg7[%c0_15, %c0_16] : memref<1x4xf32, #tpu.memory_space<vmem>>, vector<1x4xf32>
    %21 = vector.broadcast %20 : vector<1x4xf32> to vector<8x4xf32>
    %22 = arith.addf %19, %21 : vector<8x4xf32>
    %23 = arith.truncf %22 : vector<8x4xf32> to vector<8x4xbf16>
    %c0_17 = arith.constant 0 : index
    %c0_18 = arith.constant 0 : index
    %24 = vector.load %arg8[%c0_17, %c0_18] : memref<8x4xbf16, #tpu.memory_space<vmem>>, vector<8x4xbf16>
    tpu.vector_store %arg8[%c0_17, %c0_18], %23 {strides = array<i32>} : memref<8x4xbf16, #tpu.memory_space<vmem>>, vector<8x4xbf16>,
    return
  }
  func.func @transform_0(%arg0: i32) -> (i32, i32) {
    %c0_i32 = arith.constant 0 : i32
    %c0_i32_0 = arith.constant 0 : i32
    return %arg0, %c0_i32 : i32, i32
  }
  func.func @transform_1(%arg0: i32) -> (i32, i32) {
    %c0_i32 = arith.constant 0 : i32
    %c0_i32_0 = arith.constant 0 : i32
    %c0_i32_1 = arith.constant 0 : i32
    return %c0_i32, %c0_i32_0 : i32, i32
  }
  func.func @transform_2(%arg0: i32) -> (i32, i32) {
    %c0_i32 = arith.constant 0 : i32
    %c0_i32_0 = arith.constant 0 : i32
    %c0_i32_1 = arith.constant 0 : i32
    return %c0_i32, %c0_i32_0 : i32, i32
  }
  func.func @transform_3(%arg0: i32) -> (i32, i32) {
    %c0_i32 = arith.constant 0 : i32
    %c0_i32_0 = arith.constant 0 : i32
    %c0_i32_1 = arith.constant 0 : i32
    return %c0_i32, %c0_i32_0 : i32, i32
  }
  func.func @transform_4(%arg0: i32) -> (i32, i32) {
    %c0_i32 = arith.constant 0 : i32
    %c0_i32_0 = arith.constant 0 : i32
    %c0_i32_1 = arith.constant 0 : i32
    return %c0_i32, %c0_i32_0 : i32, i32
  }
  func.func @transform_5(%arg0: i32) -> (i32, i32) {
    %c0_i32 = arith.constant 0 : i32
    %c0_i32_0 = arith.constant 0 : i32
    %c0_i32_1 = arith.constant 0 : i32
    return %c0_i32, %c0_i32_0 : i32, i32
  }
  func.func @transform_6(%arg0: i32) -> (i32, i32) {
    %c0_i32 = arith.constant 0 : i32
    %c0_i32_0 = arith.constant 0 : i32
    %c0_i32_1 = arith.constant 0 : i32
    return %c0_i32, %c0_i32_0 : i32, i32
  }
  func.func @transform_7(%arg0: i32) -> (i32, i32) {
    %c0_i32 = arith.constant 0 : i32
    %c0_i32_0 = arith.constant 0 : i32
    return %arg0, %c0_i32 : i32, i32
  }
}

</mosaic_0001>

<bundles_post_ra>
// kernel: qnetwork_forward.1
= control target key start
LH: loop header
LB: loop body
LE: loop exit
PB: predicated region body
PF: predicated region fallthrough
CT: control target
= control target key end

     0   :  { %12 = vsyncpa [#allocation3], 0  ;;  %s518_s0 = inlined_call_operand.hbm [shape: f32[8,16], index: 0, kind: input, shape index: {}]   ;;  %s519_s1 = inlined_call_operand.hbm [shape: bf16[16,128], index: 1, kind: input, shape index: {}]   ;;  %s520_s2 = inlined_call_operand.vmem [shape: f32[1,128], index: 2, kind: input, shape index: {}]   ;;  %s521_s3 = inlined_call_operand.vmem [shape: bf16[128,128], index: 3, kind: input, shape index: {}]   ;;  %s522_s4 = inlined_call_operand.vmem [shape: f32[1,128], index: 4, kind: input, shape index: {}]   ;;  %s523_s5 = inlined_call_operand.vmem [shape: bf16[128,4], index: 5, kind: input, shape index: {}]   ;;  %s524_s6 = inlined_call_operand.vmem [shape: f32[1,4], index: 6, kind: input, shape index: {}]   ;;  %s525_s7 = inlined_call_operand.vmem [shape: bf16[8,4], index: 7, kind: output, shape index: {}]  }
   0x1   :  { %s19_s26 = sshll.u32 %s518_s0, 4  ;;  %s20_s26 = int_to_ptr.hbm [resolvable:$true] %s19_s26 }
   0x2   :  { %13 = vsyncpa [#allocation5], 0  ;;  %s408_s27 = smov [#allocation2]   ;;  %s29_s8 = sshll.u32 %s519_s1, 4  ;;  %s30_s8 = int_to_ptr.hbm [resolvable:$true] %s29_s8 }
   0x3   :  { %s21_s28 = sshll.u32 %s408_s27, 4  ;;  %s409_s9 = smov [#allocation4]   ;;  %s22_s28 = int_to_ptr.vmem [resolvable:$true] %s21_s28 }
   0x4   :  { %24 = dma.hbm_to_vmem [thread:$0]  %s20_s26, 128, %s22_s28, [#allocation3]  }
   0x5   :  { %s31_s10 = sshll.u32 %s409_s9, 4  ;;  %s410_s11 = smov 64   ;;  %s32_s10 = int_to_ptr.vmem [resolvable:$true] %s31_s10 }
   0x6   :  { %s411_s12 = smov 4  }
   0x7   :  { %37 = dma.hbm_to_vmem [thread:$0]  %s30_s8, 128, %s32_s10, [#allocation5], %s410_s11, %s410_s11, %s411_s12  }
   0x8   :  { %404 = dma.done.wait [#allocation3], 128  }
   0x9   :  { %405 = vsyncadd [#allocation3], 4294967168 }
   0xa   :  { %406 = dma.done.wait [#allocation5], 128  }
   0xb   :  { %407 = vsyncadd [#allocation5], 4294967168  ;;  %v332_v0 = vld [vmem:[#allocation4] sm:$0xff]  ;;  %v57_v1 = vld [vmem:[#allocation2] sm:$0xff]  ;;  %vm71_vm0 = vcmask 130048   ;;  %vm255_vm1 = vcmask 27648  }
   0xc   :  { %v340_v2 = vld [vmem:[%s521_s3 + $0x38] sm:$0xff]  ;;  %v58_v3 = vpack.c.bf16 %v57_v1, %v57_v1  ;;  %82 = vmatpush.bf16.msra.mxu0 %v332_v0  ;;  %v339_v4 = vld [vmem:[%s521_s3 + $0x30] sm:$0xff]  ;;  %v338_v5 = vld [vmem:[%s521_s3 + $0x28] sm:$0xff] }
   0xd   :  { %158 = vmatpush.bf16.msra.mxu1 %v340_v2  ;;  %v337_v6 = vld [vmem:[%s521_s3 + $0x20] sm:$0xff]  ;;  %v336_v7 = vld [vmem:[%s521_s3 + $0x18] sm:$0xff]  ;;  %v335_v8 = vld [vmem:[%s521_s3 + $0x10] sm:$0xff] }
   0xe   :  { %v334_v9 = vld [vmem:[%s521_s3 + $0x8] sm:$0xff]  ;;  %v333_v10 = vld [vmem:[%s521_s3] sm:$0xff]  ;;  %v348_v11 = vld [vmem:[%s523_s5 + $0x38] sm:$0xff] }
   0xf   :  { %267 = vmatmul.msk.bf16.vlgmr.msra.gmra.mxu0 %vm71_vm0, %v58_v3  ;;  %241 = vmatpush.bf16.msra.mxu2 %v348_v11  ;;  %v347_v12 = vld [vmem:[%s523_s5 + $0x30] sm:$0xff]  ;;  %v346_v13 = vld [vmem:[%s523_s5 + $0x28] sm:$0xff]  ;;  %v345_v14 = vld [vmem:[%s523_s5 + $0x20] sm:$0xff] }
  0x10   :  { %v344_v15 = vld [vmem:[%s523_s5 + $0x18] sm:$0xff]  ;;  %v343_v16 = vld [vmem:[%s523_s5 + $0x10] sm:$0xff]  ;;  %v353_v17 = vld [vmem:[%s520_s2] ss:$0 sm:$0xff] }
  0x11   :  { %159 = vmatpush.bf16.msra.mxu1 %v339_v4  ;;  %v342_v23 = vld [vmem:[%s523_s5 + $0x8] sm:$0xff]  ;;  %v341_v24 = vld [vmem:[%s523_s5] sm:$0xff] }
  0x12   :  { %v354_v25 = vld [vmem:[%s522_s4] ss:$0 sm:$0xff] }
  0x13   :  { %242 = vmatpush.bf16.msra.mxu2 %v347_v12  ;;  %v355_v31 = vld [vmem:[%s524_s6] ss:$0 sm:$0xff] }
  0x15   :  { %160 = vmatpush.bf16.msra.mxu1 %v338_v5 }
  0x17   :  { %243 = vmatpush.bf16.msra.mxu2 %v346_v13 }
  0x19   :  { %161 = vmatpush.bf16.msra.mxu1 %v337_v6 }
  0x1b   :  { %244 = vmatpush.bf16.msra.mxu2 %v345_v14 }
  0x1d   :  { %162 = vmatpush.bf16.msra.mxu1 %v336_v7 }
  0x1f   :  { %245 = vmatpush.bf16.msra.mxu2 %v344_v15 }
  0x21   :  { %163 = vmatpush.bf16.msra.mxu1 %v335_v8 }
  0x23   :  { %246 = vmatpush.bf16.msra.mxu2 %v343_v16 }
  0x25   :  { %164 = vmatpush.bf16.msra.mxu1 %v334_v9 }
  0x27   :  { %247 = vmatpush.bf16.msra.mxu2 %v342_v23 }
  0x29   :  { %165 = vmatpush.bf16.msra.mxu1 %v333_v10 }
  0x2b   :  { %248 = vmatpush.bf16.msra.mxu2 %v341_v24 }
  0x8c   :  { %v84_v18 = vpop.f32.mrf.mxu0 }
  0x8d   :  { %v85_v19 = vadd.f32 %v353_v17, %v84_v18 }
  0x8f   :  { %v88_v20 = vmax.f32 %v85_v19, 0.0 }
  0x91   :  { %v89_v21 = vpack.c.bf16 %v88_v20, %v88_v20 }
  0x93   :  { %166 = vmatmul.bf16.vlgmr.msra.gmra.mxu1 %v89_v21 }
  0x94   :  { %v86_v22 = vpop.f32.mrf.mxu0 }
 0x110   :  { %v167_v26 = vpop.f32.mrf.mxu1 }
 0x111   :  { %v168_v27 = vadd.f32 %v354_v25, %v167_v26 }
 0x113   :  { %v171_v28 = vmax.f32 %v168_v27, 0.0 }
 0x115   :  { %v172_v29 = vpack.c.bf16 %v171_v28, %v171_v28 }
 0x117   :  { %249 = vmatmul.bf16.vlgmr.msra.gmra.mxu2 %v172_v29 }
 0x118   :  { %v169_v30 = vpop.f32.mrf.mxu1 }
 0x19a   :  { %v250_v32 = vpop.f32.mrf.mxu2 }
 0x19b   :  { %v251_v33 = vadd.f32 %v355_v31, %v250_v32 }
 0x19d   :  { %v254_v34 = vpack.c.bf16 %v251_v33, %v251_v33 }
 0x19f   :  { %256 = vst.msk [vmem:[%s525_s7] sm:$0xf] %vm255_vm1, %v254_v34 }
 0x1a2   :  { %v252_v35 = vpop.f32.mrf.mxu2 }
 0x1a3   :  { %261 = vsyncpa [#allocation3], 1 }
 0x1a4   :  { %262 = vsyncpa [#allocation5], 1 }

</bundles_post_ra>
